<compile_context>
chip_gen: v6e
topology: v6e:2x2x1
jax: 0.10.0
libtpu: 0.0.40
codegen_flags: <defaults>
</compile_context>

<pallas_src>
import math

import jax
import jax.numpy as jnp
from jax.experimental import pallas as pl
from jax.experimental.pallas import tpu as pltpu

_LANES = 1024      # lane-dense last dim (multiple of 128)
_MAX_ROWS = 512    # 512 * 1024 * 4 B = 2 MiB f32 per tile


def _make_cosine_cutoff_kernel(cutoff: float):
    """Build a kernel with the (constant) cutoff baked in."""
    inv_cutoff_pi = math.pi / float(cutoff)
    cutoff_f = float(cutoff)

    def kernel(x_ref, o_ref):
        x = x_ref[...]
        cut = 0.5 * (jnp.cos(x * inv_cutoff_pi) + 1.0)
        # cast + multiply (instead of where) keeps torch's NaN propagation
        mask = (x < cutoff_f).astype(x.dtype)
        o_ref[...] = cut * mask

    return kernel


def _round_up(v: int, m: int) -> int:
    return ((v + m - 1) // m) * m


def cosine_cutoff_pallas(x: jax.Array, cutoff: float) -> jax.Array:
    """Elementwise Behler cosine cutoff for any float tensor shape."""
    orig_shape = x.shape
    dtype = x.dtype
    n = x.size

    if n == 0:
        return x

    # --- flatten & pad to a lane-dense (rows, _LANES) slab ----------------
    n_rows = -(-n // _LANES)                  # ceil(n / LANES)
    n_rows8 = _round_up(n_rows, 8)            # sublane alignment

    if n_rows8 <= _MAX_ROWS:
        block_rows = n_rows8
        grid_rows = 1
    else:
        # Pick the smallest number of (near-)equal blocks <= _MAX_ROWS so that
        # row padding never exceeds one sublane group per kernel invocation.
        num_blocks = -(-n_rows8 // _MAX_ROWS)
        block_rows = _round_up(-(-n_rows8 // num_blocks), 8)
        grid_rows = -(-n_rows8 // block_rows)

    padded_rows = grid_rows * block_rows
    padded_n = padded_rows * _LANES

    x_flat = x.reshape(-1)
    if padded_n != n:
        x_flat = jnp.pad(x_flat, (0, padded_n - n))
    x2d = x_flat.reshape(padded_rows, _LANES)

    out2d = pl.pallas_call(
        _make_cosine_cutoff_kernel(cutoff),
        out_shape=jax.ShapeDtypeStruct((padded_rows, _LANES), dtype),
        grid=(grid_rows,),
        in_specs=[pl.BlockSpec((block_rows, _LANES), lambda i: (i, 0))],
        out_specs=pl.BlockSpec((block_rows, _LANES), lambda i: (i, 0)),
        compiler_params=pltpu.CompilerParams(
            dimension_semantics=("parallel",)),
    )(x2d)

    out = out2d.reshape(-1)
    if padded_n != n:
        out = out[:n]
    return out.reshape(orig_shape)


class CosineCutoff:
    """JAX/Pallas equivalent of the PyTorch CosineCutoff module."""

    def __init__(self, cutoff: float):
        # Mirrors register_buffer('cutoff', torch.FloatTensor([cutoff]));
        # kept as a Python float so it is baked into the kernel at trace time.
        self.cutoff = float(cutoff)

    def __call__(self, x: jax.Array) -> jax.Array:
        return cosine_cutoff_pallas(x, self.cutoff)


def _reference(x, cutoff):
    cut = 0.5 * (jnp.cos(x * math.pi / cutoff) + 1.0)
    return cut * (x < cutoff).astype(x.dtype)


if __name__ == "__main__":
    key = jax.random.PRNGKey(0)
    # Synthetic "distance" tensor, small shape consistent with an elementwise op.
    x = jax.random.uniform(key, (2, 4, 16, 16), dtype=jnp.float32,
                           minval=0.0, maxval=8.0)

    module = CosineCutoff(cutoff=5.0)
    out = jax.block_until_ready(module(x))
    ref = _reference(x, 5.0)
    assert out.shape == x.shape and out.dtype == x.dtype
    assert jnp.allclose(out, ref, atol=1e-6, rtol=1e-6)

    # Ragged 1D edge-distance vector: exercises the pad/slice path.
    x_edges = jax.random.uniform(jax.random.PRNGKey(1), (1000,),
                                 dtype=jnp.float32, minval=0.0, maxval=8.0)
    out_edges = jax.block_until_ready(module(x_edges))
    assert jnp.allclose(out_edges, _reference(x_edges, 5.0),
                        atol=1e-6, rtol=1e-6)

    # Larger multi-block case: exercises grid > 1 and near-minimal row padding.
    x_big = jax.random.uniform(jax.random.PRNGKey(2), (600, 1100),
                               dtype=jnp.float32, minval=0.0, maxval=8.0)
    out_big = jax.block_until_ready(module(x_big))
    assert jnp.allclose(out_big, _reference(x_big, 5.0),
                        atol=1e-6, rtol=1e-6)

    print("KERNEL_OK")
</pallas_src>

<mosaic_0001>
module attributes {stable_mosaic.version = 11 : i64} {
  func.func @kernel(%arg0: i32, %arg1: memref<8x1024xf32, #tpu.memory_space<vmem>>, %arg2: memref<8x1024xf32, #tpu.memory_space<vmem>>) attributes {dimension_semantics = [#tpu.dimension_semantics<parallel>], iteration_bounds = array<i64: 1>, scalar_prefetch = 0 : i64, scratch_operands = 0 : i64, tpu.core_type = #tpu.core_type<tc>, window_params = [{transform_indices = @transform_0, window_bounds = array<i64: 8, 1024>}, {transform_indices = @transform_1, window_bounds = array<i64: 8, 1024>}]} {
    %c0 = arith.constant 0 : index
    %c0_0 = arith.constant 0 : index
    %0 = vector.load %arg1[%c0, %c0_0] : memref<8x1024xf32, #tpu.memory_space<vmem>>, vector<8x1024xf32>
    %cst = arith.constant 0.628318548 : f32
    %1 = vector.broadcast %cst : f32 to vector<8x1024xf32>
    %2 = arith.mulf %0, %1 : vector<8x1024xf32>
    %3 = math.cos %2 : vector<8x1024xf32>
    %cst_1 = arith.constant 1.000000e+00 : f32
    %4 = vector.broadcast %cst_1 : f32 to vector<8x1024xf32>
    %5 = arith.addf %3, %4 : vector<8x1024xf32>
    %cst_2 = arith.constant 5.000000e-01 : f32
    %6 = vector.broadcast %cst_2 : f32 to vector<8x1024xf32>
    %7 = arith.mulf %6, %5 : vector<8x1024xf32>
    %cst_3 = arith.constant 5.000000e+00 : f32
    %8 = vector.broadcast %cst_3 : f32 to vector<8x1024xf32>
    %9 = arith.cmpf olt, %0, %8 : vector<8x1024xf32>
    %10 = arith.extui %9 : vector<8x1024xi1> to vector<8x1024xi32>
    %11 = arith.sitofp %10 : vector<8x1024xi32> to vector<8x1024xf32>
    %12 = arith.mulf %7, %11 : vector<8x1024xf32>
    %c0_4 = arith.constant 0 : index
    %c0_5 = arith.constant 0 : index
    %13 = vector.load %arg2[%c0_4, %c0_5] : memref<8x1024xf32, #tpu.memory_space<vmem>>, vector<8x1024xf32>
    tpu.vector_store %arg2[%c0_4, %c0_5], %12 {strides = array<i32>} : memref<8x1024xf32, #tpu.memory_space<vmem>>, vector<8x1024xf32>,
    return
  }
  func.func @transform_0(%arg0: i32) -> (i32, i32) {
    %c0_i32 = arith.constant 0 : i32
    %c0_i32_0 = arith.constant 0 : i32
    return %arg0, %c0_i32 : i32, i32
  }
  func.func @transform_1(%arg0: i32) -> (i32, i32) {
    %c0_i32 = arith.constant 0 : i32
    %c0_i32_0 = arith.constant 0 : i32
    return %arg0, %c0_i32 : i32, i32
  }
}

</mosaic_0001>

<bundles_post_ra>
// kernel: tpu_custom_call.1
= control target key start
LH: loop header
LB: loop body
LE: loop exit
PB: predicated region body
PF: predicated region fallthrough
CT: control target
= control target key end

     0   :  { %6 = vsyncpa [#allocation3], 0  ;;  %s1810_s0 = inlined_call_operand.hbm [shape: f32[8,1024], index: 0, kind: input, shape index: {}]   ;;  %s1811_s1 = inlined_call_operand.hbm [shape: f32[8,1024], index: 1, kind: output, shape index: {}]  }
   0x1   :  { %7 = vsyncpa [#allocation4], 0  ;;  %s1096_s6 = smov [#allocation2]  }
   0x2   :  { %s14_s7 = sshll.u32 %s1096_s6, 4  ;;  %s15_s7 = int_to_ptr.vmem [resolvable:$true] %s14_s7 }
   0x3   :  { %s1060_s8 = scalar_lea.vmem %s15_s7, 1024  ;;  %p1065_p1 = scmp.lt.s32.totalorder %s15_s7, %s15_s7 }
   0x4   :  { %p1061_p0 = scmp.ne.s32.totalorder %s15_s7, %s1060_s8  ;;  %p1066_p2 = scmp.lt.s32.totalorder %s1060_s8, %s1060_s8 }
   0x6   :  { %p1067_p3 = por %p1066_p2, %p1065_p1 }
   0x8   :  { %p1068_p4 = pnand %p1067_p3, %p1061_p0 }
   0xa   :  { %1071 = shalt.err (!%p1068_p4)
}
   0xb   :  { %17 = dma.hbm_to_vmem [thread:$0]  %s1810_s0, 1024, %s15_s7, [#allocation3]  }
   0xc   :  { %1092 = dma.done.wait [#allocation3], 1024  }
   0xd   :  { %1093 = vsyncadd [#allocation3], 4294966272  ;;  %v21_v0 = vld [vmem:[#allocation2] sm:$0xff]  ;;  %v22_v1 = vld [vmem:[#allocation2 + $0x8] sm:$0xff]  ;;  %v1097_v33 = vmov 683565275  }
   0xe   :  { %v23_v2 = vld [vmem:[#allocation2 + $0x10] sm:$0xff]  ;;  %v1118_v3 = vmul.f32 0.62831855, %v21_v0  ;;  %v1120_v4 = vmul.f32 0.62831855, %v22_v1  ;;  %s1104_s0 = smov [#allocation5]  }
   0xf   :  { %v1122_v5 = vmul.f32 0.62831855, %v23_v2  ;;  %v1098_v35 = vmov 2475754826   ;;  %v1099_v37 = vmov 2131351028  }
  0x10   :  { %v37_v6 = vand.u32 2147483647, %v1118_v3  ;;  %v40_v7 = vand.u32 2139095040, %v1118_v3  ;;  %v140_v8 = vand.u32 2147483647, %v1120_v4  ;;  %v143_v9 = vand.u32 2139095040, %v1120_v4 }
  0x11   :  { %v246_v11 = vand.u32 2139095040, %v1122_v5  ;;  %v1100_v39 = vmov 2102212464   ;;  %v1101_v41 = vmov 920167782   ;;  %s923_s11 = sshll.u32 %s1104_s0, 4  ;;  %s924_s11 = int_to_ptr.vmem [resolvable:$true] %s923_s11 }
  0x12   :  { %v41_v10 = vshrl.u32 %v40_v7, 23  ;;  %v44_v12 = vand.u32 8388607, %v37_v6  ;;  %v144_v13 = vshrl.u32 %v143_v9, 23  ;;  %v147_v14 = vand.u32 8388607, %v140_v8  ;;  %p1077_p6 = scmp.lt.s32.totalorder %s924_s11, %s924_s11 }
  0x13   :  { %v247_v16 = vshrl.u32 %v246_v11, 23  ;;  %v1102_v49 = vmov 1326507024   ;;  %s1072_s12 = scalar_lea.vmem %s924_s11, 1024 }
  0x14   :  { %v932_v15 = vadd.s32 4294967169, %v41_v10  ;;  %v936_v17 = vadd.s32 4294967169, %v144_v13  ;;  %v45_v20 = vor.u32 8388608, %v44_v12  ;;  %v148_v21 = vor.u32 8388608, %v147_v14  ;;  %p1073_p5 = scmp.ne.s32.totalorder %s924_s11, %s1072_s12  ;;  %p1078_p7 = scmp.lt.s32.totalorder %s1072_s12, %s1072_s12 }
  0x15   :  { %v940_v19 = vadd.s32 4294967169, %v247_v16 }
  0x16   :  { %v47_v18 = vadd.s32 1, %v932_v15  ;;  %v150_v22 = vadd.s32 1, %v936_v17  ;;  %v1133_v28 = vshll.u32 %v45_v20, 8  ;;  %v1137_v31 = vshll.u32 %v148_v21, 8  ;;  %p1079_p8 = por %p1078_p7, %p1077_p6 }
  0x17   :  { %v253_v23 = vadd.s32 1, %v940_v19 }
  0x18   :  { %vm48_vm0 = vcmp.gt.s32.totalorder %v47_v18, 0  ;;  %vm151_vm1 = vcmp.gt.s32.totalorder %v150_v22, 0  ;;  %p1080_p9 = pnand %p1079_p8, %p1073_p5 }
  0x19   :  { %v49_v24 = vsel %vm48_vm0, %v47_v18, 0  ;;  %v152_v27 = vsel %vm151_vm1, %v150_v22, 0  ;;  %vm254_vm2 = vcmp.gt.s32.totalorder %v253_v23, 0 }
  0x1a   :  { %v50_v25 = vshrl.u32 %v49_v24, 5  ;;  %v51_v26 = vand.u32 31, %v49_v24  ;;  %v1135_v29 = vshrl.u32 %v152_v27, 5  ;;  %v154_v30 = vand.u32 31, %v152_v27 }
  0x1b   :  { %v1145_v43 = vsel %vm254_vm2, %v253_v23, 0 }
  0x1c   :  { %v52_v32 = vsub.s32 32, %v51_v26  ;;  %v54_v34 = vshll.u32 %v1097_v33, %v51_v26  ;;  %v57_v36 = vshll.u32 %v1098_v35, %v51_v26  ;;  %v60_v38 = vshll.u32 %v1099_v37, %v51_v26 }
  0x1d   :  { %v63_v40 = vshll.u32 %v1100_v39, %v51_v26  ;;  %v66_v42 = vshll.u32 %v1101_v41, %v51_v26  ;;  %vm69_vm3 = vcmp.lt.s32.totalorder %v50_v25, 1  ;;  %vm70_vm4 = vcmp.lt.s32.totalorder %v50_v25, 2 }
  0x1e   :  { %v53_v44 = vshrl.u32 %v1097_v33, %v52_v32  ;;  %v55_v45 = vshrl.u32 %v1098_v35, %v52_v32  ;;  %v58_v46 = vshrl.u32 %v1099_v37, %v52_v32  ;;  %v61_v47 = vshrl.u32 %v1100_v39, %v52_v32 }
  0x1f   :  { %v64_v48 = vshrl.u32 %v1101_v41, %v52_v32  ;;  %v67_v50 = vshrl.u32 %v1102_v49, %v52_v32  ;;  %vm72_vm5 = vcmp.lt.s32.totalorder %v50_v25, 4  ;;  %v155_v54 = vsub.s32 32, %v154_v30 }
  0x20   :  { %v56_v51 = vor.u32 %v55_v45, %v54_v34  ;;  %v59_v52 = vor.u32 %v58_v46, %v57_v36  ;;  %v62_v53 = vor.u32 %v61_v47, %v60_v38  ;;  %vm71_vm6 = vcmp.lt.s32.totalorder %v50_v25, 3 }
  0x21   :  { %v65_v55 = vor.u32 %v64_v48, %v63_v40  ;;  %v68_v56 = vor.u32 %v67_v50, %v66_v42  ;;  %v157_v57 = vshll.u32 %v1097_v33, %v154_v30  ;;  %v160_v1 = vshll.u32 %v1098_v35, %v154_v30 }
  0x22   :  { %v73_v58 = vsel %vm69_vm3, %v53_v44, %v56_v51  ;;  %v74_v59 = vsel %vm72_vm5, %v62_v53, 2102212464  ;;  %v77_v60 = vsel %vm69_vm3, %v56_v51, %v59_v52  ;;  %v81_v61 = vsel %vm69_vm3, %v59_v52, %v62_v53 }
  0x23   :  { %v75_v62 = vsel %vm71_vm6, %v59_v52, %v74_v59  ;;  %v78_v63 = vsel %vm72_vm5, %v65_v55, 920167782  ;;  %v82_v0 = vsel %vm72_vm5, %v68_v56, 1326507024  ;;  %v156_v9 = vshrl.u32 %v1097_v33, %v155_v54 }
  0x24   :  { %v79_v2 = vsel %vm71_vm6, %v62_v53, %v78_v63  ;;  %v83_v7 = vsel %vm71_vm6, %v65_v55, %v82_v0  ;;  %v158_v10 = vshrl.u32 %v1098_v35, %v155_v54  ;;  %v76_v11 = vsel %vm70_vm4, %v73_v58, %v75_v62  ;;  %v24_v55 = vld [vmem:[#allocation2 + $0x18] sm:$0xff] }
  0x25   :  { %v80_v12 = vsel %vm70_vm4, %v77_v60, %v79_v2  ;;  %v84_v13 = vsel %vm70_vm4, %v81_v61, %v83_v7  ;;  %v161_v14 = vshrl.u32 %v1099_v37, %v155_v54  ;;  %v163_v21 = vshll.u32 %v1099_v37, %v154_v30 }
  0x26   :  { %v1165_v15 = vmul.u32.u64.low %v1133_v28, %v84_v13  ;;  %v1166_v16 = vmul.u32.u64.high %v1133_v28, %v84_v13, %v1165_v15  ;;  %v1169_v17 = vmul.u32.u64.low %v1133_v28, %v80_v12  ;;  %v1170_v18 = vmul.u32.u64.high %v1133_v28, %v80_v12, %v1169_v17 }
  0x27   :  { %v159_v19 = vor.u32 %v158_v10, %v157_v57  ;;  %v162_v20 = vor.u32 %v161_v14, %v160_v1  ;;  %v164_v22 = vshrl.u32 %v1100_v39, %v155_v54  ;;  %v166_v23 = vshll.u32 %v1100_v39, %v154_v30 }
  0x28   :  { %v167_v24 = vshrl.u32 %v1101_v41, %v155_v54  ;;  %v169_v25 = vshll.u32 %v1101_v41, %v154_v30  ;;  %v170_v26 = vshrl.u32 %v1102_v49, %v155_v54  ;;  %v92_v27 = vmul.u32 %v1133_v28, %v76_v11 }
  0x29   :  { %v165_v32 = vor.u32 %v164_v22, %v163_v21  ;;  %vm172_vm7 = vcmp.lt.s32.totalorder %v1135_v29, 1  ;;  %vm173_vm8 = vcmp.lt.s32.totalorder %v1135_v29, 2  ;;  %vm94_vm9 = vc.u32 %v1166_v16, %v1169_v17 }
  0x2a   :  { %v95_v34 = vadd.s32 1, %v1170_v18  ;;  %v168_v36 = vor.u32 %v167_v24, %v166_v23  ;;  %vm174_vm10 = vcmp.lt.s32.totalorder %v1135_v29, 3  ;;  %v171_v38 = vor.u32 %v170_v26, %v169_v25 }
  0x2b   :  { %vm175_vm11 = vcmp.lt.s32.totalorder %v1135_v29, 4  ;;  %v176_v30 = vsel %vm172_vm7, %v156_v9, %v159_v19  ;;  %v180_v40 = vsel %vm172_vm7, %v159_v19, %v162_v20  ;;  %v184_v45 = vsel %vm172_vm7, %v162_v20, %v165_v32 }
  0x2c   :  { %v96_v28 = vsel %vm94_vm9, %v95_v34, %v1170_v18  ;;  %v177_v42 = vsel %vm175_vm11, %v165_v32, 2102212464  ;;  %v181_v44 = vsel %vm175_vm11, %v168_v36, 920167782  ;;  %v185_v50 = vsel %vm175_vm11, %v171_v38, 1326507024 }
  0x2d   :  { %v97_v46 = vadd.s32 %v96_v28, %v92_v27  ;;  %v178_v47 = vsel %vm174_vm10, %v162_v20, %v177_v42  ;;  %v182_v48 = vsel %vm174_vm10, %v165_v32, %v181_v44  ;;  %v186_v53 = vsel %vm174_vm10, %v168_v36, %v185_v50 }
  0x2e   :  { %v179_v51 = vsel %vm173_vm8, %v176_v30, %v178_v47  ;;  %v183_v52 = vsel %vm173_vm8, %v180_v40, %v182_v48  ;;  %v243_v54 = vand.u32 2147483647, %v1122_v5  ;;  %v187_v57 = vsel %vm173_vm8, %v184_v45, %v186_v53 }
  0x2f   :  { %v98_v56 = vadd.s32 536870912, %v97_v46  ;;  %v1196_v58 = vmul.u32.u64.low %v1137_v31, %v183_v52  ;;  %v1197_v59 = vmul.u32.u64.high %v1137_v31, %v183_v52, %v1196_v58  ;;  %v257_v62 = vand.u32 31, %v1145_v43 }
  0x30   :  { %v1201_v60 = vmul.u32.u64.low %v1137_v31, %v187_v57  ;;  %v1202_v61 = vmul.u32.u64.high %v1137_v31, %v187_v57, %v1201_v60  ;;  %v1207_v0 = vmul.f32 0.62831855, %v24_v55  ;;  %v195_v1 = vmul.u32 %v1137_v31, %v179_v51 }
  0x31   :  { %v1205_v63 = vshrl.u32 %v98_v56, 30  ;;  %v258_v2 = vsub.s32 32, %v257_v62  ;;  %v198_v7 = vadd.s32 1, %v1197_v59  ;;  %v250_v9 = vand.u32 8388607, %v243_v54 }
  0x32   :  { %v256_v10 = vshrl.u32 %v1145_v43, 5  ;;  %vm197_vm12 = vc.u32 %v1202_v61, %v1196_v58  ;;  %v260_v11 = vshll.u32 %v1097_v33, %v257_v62  ;;  %v263_v12 = vshll.u32 %v1098_v35, %v257_v62 }
  0x33   :  { %v100_v29 = vshll.u32 %v1205_v63, 30  ;;  %v266_v13 = vshll.u32 %v1099_v37, %v257_v62  ;;  %v199_v14 = vsel %vm197_vm12, %v198_v7, %v1197_v59  ;;  %v261_v15 = vshrl.u32 %v1098_v35, %v258_v2 }
  0x34   :  { %v264_v18 = vshrl.u32 %v1099_v37, %v258_v2  ;;  %v200_v19 = vadd.s32 %v199_v14, %v195_v1  ;;  %v267_v20 = vshrl.u32 %v1100_v39, %v258_v2  ;;  %v269_v43 = vshll.u32 %v1100_v39, %v257_v62 }
  0x35   :  { %v101_v31 = vsub.s32 %v97_v46, %v100_v29  ;;  %v251_v22 = vor.u32 8388608, %v250_v9  ;;  %v270_v23 = vshrl.u32 %v1101_v41, %v258_v2  ;;  %v349_v24 = vand.u32 2139095040, %v1207_v0 }
  0x36   :  { %v201_v25 = vadd.s32 536870912, %v200_v19  ;;  %v272_v26 = vshll.u32 %v1101_v41, %v257_v62  ;;  %v273_v27 = vshrl.u32 %v1102_v49, %v258_v2  ;;  %vm275_vm13 = vcmp.lt.s32.totalorder %v256_v10, 1 }
  0x37   :  { %v103_v21 = vsub.s32 0, %v101_v31  ;;  %v262_v34 = vor.u32 %v261_v15, %v260_v11  ;;  %v265_v36 = vor.u32 %v264_v18, %v263_v12  ;;  %v268_v38 = vor.u32 %v267_v20, %v266_v13 }
  0x38   :  { %v1229_v30 = vshrl.u32 %v201_v25, 30  ;;  %v271_v40 = vor.u32 %v270_v23, %v269_v43  ;;  %v274_v28 = vor.u32 %v273_v27, %v272_v26  ;;  %vm278_vm14 = vcmp.lt.s32.totalorder %v256_v10, 4 }
  0x39   :  { %v933_v32 = vmin.u32 %v103_v21, %v101_v31  ;;  %v259_v44 = vshrl.u32 %v1097_v33, %v258_v2  ;;  %vm277_vm15 = vcmp.lt.s32.totalorder %v256_v10, 3  ;;  %v291_v45 = vshll.u32 %v251_v22, 8 }
  0x3a   :  { %v203_v46 = vshll.u32 %v1229_v30, 30  ;;  %v280_v47 = vsel %vm278_vm14, %v268_v38, 2102212464  ;;  %v284_v48 = vsel %vm278_vm14, %v271_v40, 920167782  ;;  %v350_v50 = vshrl.u32 %v349_v24, 23 }
  0x3b   :  { %v105_v42 = vclz %v933_v32  ;;  %v93_v51 = vadd.s32 %v1169_v17, %v1166_v16  ;;  %vm276_vm0 = vcmp.lt.s32.totalorder %v256_v10, 2  ;;  %v287_v53 = vsel %vm275_vm13, %v265_v36, %v268_v38 }
  0x3c   :  { %v1238_v55 = vsub.s32 %v200_v19, %v203_v46  ;;  %v283_v56 = vsel %vm275_vm13, %v262_v34, %v265_v36  ;;  %v285_v57 = vsel %vm277_vm15, %v268_v38, %v284_v48  ;;  %v288_v59 = vsel %vm278_vm14, %v274_v28, 1326507024  ;;  %v25_v38 = vld [vmem:[#allocation2 + $0x20] sm:$0xff] }
  0x3d   :  { %v934_v52 = vadd.s32 4294967294, %v105_v42  ;;  %v279_v60 = vsel %vm275_vm13, %v259_v44, %v262_v34  ;;  %v281_v62 = vsel %vm277_vm15, %v265_v36, %v280_v47  ;;  %v289_v1 = vsel %vm277_vm15, %v271_v40, %v288_v59 }
  0x3e   :  { %v206_v17 = vsub.s32 0, %v1238_v55  ;;  %v290_v2 = vsel %vm276_vm0, %v287_v53, %v289_v1  ;;  %v944_v29 = vadd.s32 4294967169, %v350_v50  ;;  %v286_v12 = vsel %vm276_vm0, %v283_v56, %v285_v57 }
  0x3f   :  { %vm935_vm1 = vcmp.lt.s32.totalorder %v934_v52, 0  ;;  %v282_v14 = vsel %vm276_vm0, %v279_v60, %v281_v62  ;;  %v1251_v19 = vmul.u32.u64.low %v291_v45, %v290_v2  ;;  %v1252_v20 = vmul.u32.u64.high %v291_v45, %v290_v2, %v1251_v19 }
  0x40   :  { %v108_v16 = vsel %vm935_vm1, 0, %v934_v52  ;;  %v937_v13 = vmin.u32 %v206_v17, %v1238_v55  ;;  %v1254_v21 = vmul.u32.u64.low %v291_v45, %v286_v12  ;;  %v1255_v22 = vmul.u32.u64.high %v291_v45, %v286_v12, %v1254_v21 }
  0x41   :  { %v109_v7 = vsub.s32 32, %v108_v16  ;;  %v110_v9 = vshll.u32 %v101_v31, %v108_v16  ;;  %v113_v11 = vsub.s32 4294967266, %v108_v16  ;;  %v356_v23 = vadd.s32 1, %v944_v29 }
  0x42   :  { %v208_v43 = vclz %v937_v13  ;;  %v298_v32 = vmul.u32 %v291_v45, %v282_v14  ;;  %vm300_vm3 = vc.u32 %v1252_v20, %v1254_v21  ;;  %v301_v10 = vadd.s32 1, %v1255_v22 }
  0x43   :  { %v111_v15 = vshrl.u32 %v93_v51, %v109_v7  ;;  %v114_v18 = vadd.s32 127, %v113_v11  ;;  %vm357_vm2 = vcmp.gt.s32.totalorder %v356_v23, 0  ;;  %v346_v34 = vand.u32 2147483647, %v1207_v0 }
  0x44   :  { %v938_v25 = vadd.s32 4294967294, %v208_v43  ;;  %v358_v36 = vsel %vm357_vm2, %v356_v23, 0  ;;  %v196_v28 = vadd.s32 %v1196_v58, %v1202_v61  ;;  %v302_v45 = vsel %vm300_vm3, %v301_v10, %v1255_v22 }
  0x45   :  { %v112_v24 = vor.u32 %v111_v15, %v110_v9  ;;  %v115_v31 = vshll.u32 %v114_v18, 23  ;;  %v360_v44 = vand.u32 31, %v358_v36  ;;  %v303_v50 = vadd.s32 %v302_v45, %v298_v32 }
  0x46   :  { %vm939_vm4 = vcmp.lt.s32.totalorder %v938_v25, 0  ;;  %v1265_v52 = vmul.f32 0.62831855, %v25_v38  ;;  %v123_v53 = vsub.s32 4, %v1205_v63  ;;  %v353_v57 = vand.u32 8388607, %v346_v34 }
  0x47   :  { %v116_v26 = vor.u32 4788187, %v115_v31  ;;  %v119_v27 = vcvt.s32.f32 %v112_v24  ;;  %v211_v42 = vsel %vm939_vm4, 0, %v938_v25  ;;  %v361_v51 = vsub.s32 32, %v360_v44 }
  0x48   :  { %v212_v46 = vsub.s32 32, %v211_v42  ;;  %v216_v47 = vsub.s32 4294967266, %v211_v42  ;;  %vm39_vm5 = vcmp.lt.s32.totalorder %v1118_v3, 0  ;;  %v213_v58 = vshll.u32 %v1238_v55, %v211_v42 }
  0x49   :  { %v117_v40 = vand.u32 2147483647, %v116_v26  ;;  %v304_v59 = vadd.s32 536870912, %v303_v50  ;;  %vm1274_vm6 = vcmp.le.f32.partialorder %v37_v6, 0.7853982  ;;  %v363_v1 = vshll.u32 %v1097_v33, %v360_v44 }
  0x4a   :  { %v217_v56 = vadd.s32 127, %v216_v47  ;;  %v214_v61 = vshrl.u32 %v196_v28, %v212_v46  ;;  %v364_v16 = vshrl.u32 %v1098_v35, %v361_v51  ;;  %v366_v29 = vshll.u32 %v1098_v35, %v360_v44 }
  0x4b   :  { %v120_v48 = vmul.f32 %v119_v27, %v117_v40  ;;  %v1280_v2 = vshrl.u32 %v304_v59, 30  ;;  %v367_v55 = vshrl.u32 %v1099_v37, %v361_v51  ;;  %v1287_v7 = vsel %vm39_vm5, %v123_v53, %v1205_v63 }
  0x4c   :  { %v218_v17 = vshll.u32 %v217_v56, 23  ;;  %v354_v6 = vor.u32 8388608, %v353_v57  ;;  %v359_v9 = vshrl.u32 %v358_v36, 5  ;;  %v372_v11 = vshll.u32 %v1100_v39, %v360_v44 }
  0x4d   :  { %v121_v62 = vxor.u32 2147483648, %v120_v48  ;;  %v215_v12 = vor.u32 %v214_v61, %v213_v58  ;;  %v306_v13 = vshll.u32 %v1280_v2, 30  ;;  %v369_v14 = vshll.u32 %v1099_v37, %v360_v44 }
  0x4e   :  { %v370_v15 = vshrl.u32 %v1100_v39, %v361_v51  ;;  %v365_v19 = vor.u32 %v364_v16, %v363_v1  ;;  %v373_v43 = vshrl.u32 %v1101_v41, %v361_v51  ;;  %v375_v63 = vshll.u32 %v1101_v41, %v360_v44 }
  0x4f   :  { %v122_v18 = vsel %vm39_vm5, %v121_v62, %v120_v48  ;;  %v219_v22 = vor.u32 4788187, %v218_v17  ;;  %v1297_v23 = vsub.s32 %v303_v50, %v306_v13  ;;  %v368_v24 = vor.u32 %v367_v55, %v366_v29 }
  0x50   :  { %v376_v31 = vshrl.u32 %v1102_v49, %v361_v51  ;;  %v226_v25 = vsub.s32 4, %v1229_v30  ;;  %v374_v26 = vor.u32 %v373_v43, %v372_v11  ;;  %vm378_vm7 = vcmp.lt.s32.totalorder %v359_v9, 1 }
  0x51   :  { %v1301_v27 = vshll.u32 %v354_v6, 8  ;;  %v125_v32 = vsel %vm1274_vm6, %v1118_v3, %v122_v18  ;;  %v309_v10 = vsub.s32 0, %v1297_v23  ;;  %v362_v36 = vshrl.u32 %v1097_v33, %v361_v51 }
  0x52   :  { %v371_v38 = vor.u32 %v370_v15, %v369_v14  ;;  %v222_v40 = vcvt.s32.f32 %v215_v12  ;;  %v377_v28 = vor.u32 %v376_v31, %v375_v63  ;;  %vm380_vm8 = vcmp.lt.s32.totalorder %v359_v9, 3 }
  0x53   :  { %vm381_vm9 = vcmp.lt.s32.totalorder %v359_v9, 4  ;;  %v220_v42 = vand.u32 2147483647, %v219_v22  ;;  %v941_v44 = vmin.u32 %v309_v10, %v1297_v23  ;;  %vm379_vm10 = vcmp.lt.s32.totalorder %v359_v9, 2  ;;  %v28_v10 = vld [vmem:[#allocation2 + $0x38] sm:$0xff] }
  0x54   :  { %v386_v46 = vsel %vm378_vm7, %v365_v19, %v368_v24  ;;  %v299_v47 = vadd.s32 %v1254_v21, %v1252_v20  ;;  %v383_v45 = vsel %vm381_vm9, %v371_v38, 2102212464  ;;  %v387_v48 = vsel %vm381_vm9, %v374_v26, 920167782 }
  0x55   :  { %v452_v50 = vand.u32 2139095040, %v1265_v52  ;;  %1013 = vcosq.f32 %v125_v32  ;;  %v311_v51 = vclz %v941_v44  ;;  %v388_v53 = vsel %vm380_vm8, %v371_v38, %v387_v48 }
  0x56   :  { %v390_v56 = vsel %vm378_vm7, %v368_v24, %v371_v38  ;;  %v382_v57 = vsel %vm378_vm7, %v362_v36, %v365_v19  ;;  %v384_v58 = vsel %vm380_vm8, %v368_v24, %v383_v45  ;;  %v389_v61 = vsel %vm379_vm10, %v386_v46, %v388_v53 }
  0x57   :  { %v391_v20 = vsel %vm381_vm9, %v377_v28, 1326507024  ;;  %1015 = vsinq.f32 %v125_v32  ;;  %v223_v21 = vmul.f32 %v222_v40, %v220_v42  ;;  %v942_v59 = vadd.s32 4294967294, %v311_v51 }
  0x58   :  { %v392_v62 = vsel %vm380_vm8, %v374_v26, %v391_v20  ;;  %v1324_v16 = vmul.u32.u64.low %v1301_v27, %v389_v61  ;;  %v1325_v17 = vmul.u32.u64.high %v1301_v27, %v389_v61, %v1324_v16  ;;  %v453_v29 = vshrl.u32 %v452_v50, 23 }
  0x59   :  { %v393_v1 = vsel %vm379_vm10, %v390_v56, %v392_v62  ;;  %vm943_vm11 = vcmp.lt.s32.totalorder %v942_v59, 0  ;;  %v385_v55 = vsel %vm379_vm10, %v382_v57, %v384_v58  ;;  %vm142_vm12 = vcmp.lt.s32.totalorder %v1120_v4, 0 }
  0x5a   :  { %v1330_v6 = vmul.u32.u64.low %v1301_v27, %v393_v1  ;;  %v1331_v11 = vmul.u32.u64.high %v1301_v27, %v393_v1, %v1330_v6  ;;  %v314_v12 = vsel %vm943_vm11, 0, %v942_v59  ;;  %v948_v13 = vadd.s32 4294967169, %v453_v29 }
  0x5b   :  { %v126_v14 = vsel %vm1274_vm6, 0, %v1287_v7  ;;  %v224_v15 = vxor.u32 2147483648, %v223_v21  ;;  %v315_v18 = vsub.s32 32, %v314_v12  ;;  %v319_v19 = vsub.s32 4294967266, %v314_v12  ;;  %v27_v7 = vld [vmem:[#allocation2 + $0x30] sm:$0xff] }
  0x5c   :  { %v227_v9 = vsel %vm142_vm12, %v226_v25, %v1229_v30  ;;  %v401_v43 = vmul.u32 %v1301_v27, %v385_v55  ;;  %v404_v63 = vadd.s32 1, %v1325_v17  ;;  %v459_v22 = vadd.s32 1, %v948_v13  ;;  %v1353_v30 = vld [vmem:[#allocation2 + $0x28] sm:$0xff] }
  0x5d   :  { %v316_v24 = vshll.u32 %v1297_v23, %v314_v12  ;;  %v317_v31 = vshrl.u32 %v299_v47, %v315_v18  ;;  %v320_v26 = vadd.s32 127, %v319_v19  ;;  %v329_v32 = vsub.s32 4, %v1280_v2 }
  0x5e   :  { %vm1346_vm13 = vcmp.le.f32.partialorder %v140_v8, 0.7853982  ;;  %vm245_vm14 = vcmp.lt.s32.totalorder %v1122_v5, 0  ;;  %vm403_vm15 = vc.u32 %v1331_v11, %v1324_v16  ;;  %vm460_vm0 = vcmp.gt.s32.totalorder %v459_v22, 0 }
  0x5f   :  { %v1355_v23 = vand.u32 3, %v126_v14  ;;  %v225_v25 = vsel %vm142_vm12, %v224_v15, %v223_v21  ;;  %v321_v27 = vshll.u32 %v320_v26, 23  ;;  %v405_v8 = vsel %vm403_vm15, %v404_v63, %v1325_v17 }
  0x60   :  { %v229_v36 = vsel %vm1346_vm13, 0, %v227_v9  ;;  %v406_v38 = vadd.s32 %v405_v8, %v401_v43  ;;  %v449_v40 = vand.u32 2147483647, %v1265_v52  ;;  %v461_v28 = vsel %vm460_vm0, %v459_v22, 0 }
  0x61   :  { %v318_v42 = vor.u32 %v317_v31, %v316_v24  ;;  %v322_v44 = vor.u32 4788187, %v321_v27  ;;  %v1366_v46 = vsel %vm245_vm14, %v329_v32, %v1280_v2  ;;  %v463_v47 = vand.u32 31, %v461_v28 }
  0x62   :  { %v1368_v45 = vpop.eup %1013  ;;  %v1371_v48 = vmul.f32 0.62831855, %v1353_v30  ;;  %v1373_v50 = vmul.f32 0.62831855, %v27_v7  ;;  %v228_v51 = vsel %vm1346_vm13, %v1120_v4, %v225_v25  ;;  %v407_v53 = vadd.s32 536870912, %v406_v38 }
  0x63   :  { %v1378_v56 = vmul.f32 0.62831855, %v28_v10  ;;  %vm135_vm1 = vcmp.eq.s32.totalorder %v1355_v23, 2  ;;  %vm1383_vm2 = vcmp.le.f32.partialorder %v243_v54, 0.7853982  ;;  %v464_v57 = vsub.s32 32, %v463_v47 }
  0x64   :  { %v1387_v58 = vpop.eup %1015  ;;  %v1389_v61 = vand.u32 3, %v229_v36  ;;  %v332_v20 = vsel %vm1383_vm2, 0, %v1366_v46  ;;  %v1394_v21 = vshrl.u32 %v407_v53, 30  ;;  %v456_v59 = vand.u32 8388607, %v449_v40 }
  0x65   :  { %v136_v62 = vxor.u32 2147483648, %v1368_v45  ;;  %1017 = vcosq.f32 %v228_v51  ;;  %v323_v54 = vand.u32 2147483647, %v322_v44  ;;  %v325_v1 = vcvt.s32.f32 %v318_v42 }
  0x66   :  { %1019 = vsinq.f32 %v228_v51  ;;  %v409_v17 = vshll.u32 %v1394_v21, 30  ;;  %v466_v29 = vshll.u32 %v1097_v33, %v463_v47  ;;  %v467_v55 = vshrl.u32 %v1098_v35, %v464_v57 }
  0x67   :  { %v469_v6 = vshll.u32 %v1098_v35, %v463_v47  ;;  %v470_v12 = vshrl.u32 %v1099_v37, %v464_v57  ;;  %v472_v13 = vshll.u32 %v1099_v37, %v463_v47  ;;  %v473_v14 = vshrl.u32 %v1100_v39, %v464_v57 }
  0x68   :  { %vm132_vm3 = vcmp.eq.s32.totalorder %v1355_v23, 0  ;;  %v133_v15 = vxor.u32 2147483648, %v1387_v58  ;;  %v1408_v18 = vsub.s32 %v406_v38, %v409_v17  ;;  %v457_v19 = vor.u32 8388608, %v456_v59 }
  0x69   :  { %v462_v9 = vshrl.u32 %v461_v28, 5  ;;  %v1413_v43 = vsel %vm135_vm1, %v136_v62, %v1387_v58  ;;  %v326_v63 = vmul.f32 %v325_v1, %v323_v54  ;;  %v402_v22 = vadd.s32 %v1324_v16, %v1331_v11 }
  0x6a   :  { %v475_v24 = vshll.u32 %v1100_v39, %v463_v47  ;;  %v412_v31 = vsub.s32 0, %v1408_v18  ;;  %v465_v26 = vshrl.u32 %v1097_v33, %v464_v57  ;;  %v468_v32 = vor.u32 %v467_v55, %v466_v29 }
  0x6b   :  { %v476_v60 = vshrl.u32 %v1101_v41, %v464_v57  ;;  %v471_v7 = vor.u32 %v470_v12, %v469_v6  ;;  %v474_v25 = vor.u32 %v473_v14, %v472_v13  ;;  %v478_v27 = vshll.u32 %v1101_v41, %v463_v47 }
  0x6c   :  { %v479_v8 = vshrl.u32 %v1102_v49, %v464_v57  ;;  %vm131_vm4 = vcmp.lt.s32.totalorder %v1355_v23, 2  ;;  %v945_v10 = vmin.u32 %v412_v31, %v1408_v18  ;;  %vm481_vm5 = vcmp.lt.s32.totalorder %v462_v9, 1 }
  0x6d   :  { %v497_v16 = vshll.u32 %v457_v19, 8  ;;  %v555_v11 = vand.u32 2139095040, %v1371_v48  ;;  %v327_v36 = vxor.u32 2147483648, %v326_v63  ;;  %v477_v38 = vor.u32 %v476_v60, %v475_v24 }
  0x6e   :  { %v480_v28 = vor.u32 %v479_v8, %v478_v27  ;;  %vm482_vm6 = vcmp.lt.s32.totalorder %v462_v9, 2  ;;  %v414_v42 = vclz %v945_v10  ;;  %vm483_vm7 = vcmp.lt.s32.totalorder %v462_v9, 3 }
  0x6f   :  { %vm484_vm8 = vcmp.lt.s32.totalorder %v462_v9, 4  ;;  %v485_v44 = vsel %vm481_vm5, %v465_v26, %v468_v32  ;;  %v489_v47 = vsel %vm481_vm5, %v468_v32, %v471_v7  ;;  %v493_v57 = vsel %vm481_vm5, %v471_v7, %v474_v25 }
  0x70   :  { %v486_v51 = vsel %vm484_vm8, %v474_v25, 2102212464  ;;  %v490_v53 = vsel %vm484_vm8, %v477_v38, 920167782  ;;  %vm129_vm9 = vweird.f32 %v1118_v3  ;;  %v946_v58 = vadd.s32 4294967294, %v414_v42 }
  0x71   :  { %v487_v59 = vsel %vm483_vm7, %v471_v7, %v486_v51  ;;  %v491_v62 = vsel %vm483_vm7, %v474_v25, %v490_v53  ;;  %v494_v54 = vsel %vm484_vm8, %v480_v28, 1326507024  ;;  %vm235_vm10 = vcmp.eq.s32.totalorder %v1389_v61, 0 }
  0x72   :  { %vm348_vm11 = vcmp.lt.s32.totalorder %v1207_v0, 0  ;;  %v488_v1 = vsel %vm482_vm6, %v485_v44, %v487_v59  ;;  %v492_v17 = vsel %vm482_vm6, %v489_v47, %v491_v62  ;;  %v495_v29 = vsel %vm483_vm7, %v477_v38, %v494_v54  ;;  %v1018_v6 = vpop.eup %1017 }
  0x73   :  { %v556_v55 = vshrl.u32 %v555_v11, 23  ;;  %vm947_vm12 = vcmp.lt.s32.totalorder %v946_v58, 0  ;;  %v496_v12 = vsel %vm482_vm6, %v493_v57, %v495_v29  ;;  %v1020_v19 = vpop.eup %1019  ;;  %v134_v24 = vsel %vm132_vm3, %v1368_v45, %v133_v15 }
  0x74   :  { %v1435_v13 = vmul.u32.u64.low %v497_v16, %v492_v17  ;;  %v1436_v14 = vmul.u32.u64.high %v497_v16, %v492_v17, %v1435_v13  ;;  %v417_v31 = vsel %vm947_vm12, 0, %v946_v58  ;;  %vm1447_vm13 = vcmp.le.f32.partialorder %v346_v34, 0.7853982 }
  0x75   :  { %v1442_v26 = vmul.u32.u64.low %v497_v16, %v496_v12  ;;  %v1443_v32 = vmul.u32.u64.high %v497_v16, %v496_v12, %v1442_v26  ;;  %v418_v9 = vsub.s32 32, %v417_v31  ;;  %v419_v7 = vshll.u32 %v1408_v18, %v417_v31 }
  0x76   :  { %v422_v25 = vsub.s32 4294967266, %v417_v31  ;;  %v952_v27 = vadd.s32 4294967169, %v556_v55  ;;  %v328_v8 = vsel %vm245_vm14, %v327_v36, %v326_v63  ;;  %v432_v45 = vsub.s32 4, %v1394_v21 }
  0x77   :  { %v504_v15 = vmul.u32 %v497_v16, %v488_v1  ;;  %v552_v10 = vand.u32 2147483647, %v1371_v48  ;;  %v420_v11 = vshrl.u32 %v402_v22, %v418_v9  ;;  %v507_v34 = vadd.s32 1, %v1436_v14 }
  0x78   :  { %v423_v38 = vadd.s32 127, %v422_v25  ;;  %v562_v28 = vadd.s32 1, %v952_v27  ;;  %v138_v42 = vsel %vm131_vm4, %v134_v24, %v1413_v43  ;;  %v236_v18 = vxor.u32 2147483648, %v1020_v19 }
  0x79   :  { %v239_v44 = vxor.u32 2147483648, %v1018_v6  ;;  %vm506_vm15 = vc.u32 %v1443_v32, %v1435_v13  ;;  %v421_v63 = vor.u32 %v420_v11, %v419_v7  ;;  %vm238_vm0 = vcmp.eq.s32.totalorder %v1389_v61, 2 }
  0x7a   :  { %v424_v36 = vshll.u32 %v423_v38, 23  ;;  %v508_v16 = vsel %vm506_vm15, %v507_v34, %v1436_v14  ;;  %vm563_vm14 = vcmp.gt.s32.totalorder %v562_v28, 0  ;;  %v331_v22 = vsel %vm1383_vm2, %v1122_v5, %v328_v8 }
  0x7b   :  { %v509_v51 = vadd.s32 %v508_v16, %v504_v15  ;;  %v564_v47 = vsel %vm563_vm14, %v562_v28, 0  ;;  %v428_v43 = vcvt.s32.f32 %v421_v63  ;;  %v1470_v53 = vsel %vm348_vm11, %v432_v45, %v1394_v21 }
  0x7c   :  { %v425_v23 = vor.u32 4788187, %v424_v36  ;;  %v559_v57 = vand.u32 8388607, %v552_v10  ;;  %v1476_v58 = vsel %vm129_vm9, nan, %v138_v42  ;;  %v1482_v59 = vand.u32 3, %v332_v20 }
  0x7d   :  { %v510_v62 = vadd.s32 536870912, %v509_v51  ;;  %v566_v54 = vand.u32 31, %v564_v47  ;;  %v1486_v1 = vsel %vm235_vm10, %v1018_v6, %v236_v18  ;;  %v1488_v21 = vsel %vm238_vm0, %v239_v44, %v1020_v19 }
  0x7e   :  { %1021 = vcosq.f32 %v331_v22  ;;  %v426_v17 = vand.u32 2147483647, %v425_v23  ;;  %v435_v3 = vsel %vm1447_vm13, 0, %v1470_v53  ;;  %v560_v29 = vor.u32 8388608, %v559_v57 }
  0x7f   :  { %1023 = vsinq.f32 %v331_v22  ;;  %v1493_v2 = vshrl.u32 %v510_v62, 30  ;;  %v567_v46 = vsub.s32 32, %v566_v54  ;;  %v565_v55 = vshrl.u32 %v564_v47, 5 }
  0x80   :  { %v429_v20 = vmul.f32 %v428_v43, %v426_v17  ;;  %v569_v12 = vshll.u32 %v1097_v33, %v566_v54  ;;  %v572_v19 = vshll.u32 %v1098_v35, %v566_v54  ;;  %v575_v24 = vshll.u32 %v1099_v37, %v566_v54 }
  0x81   :  { %v512_v6 = vshll.u32 %v1493_v2, 30  ;;  %v570_v14 = vshrl.u32 %v1098_v35, %v567_v46  ;;  %v573_v26 = vshrl.u32 %v1099_v37, %v567_v46  ;;  %v576_v9 = vshrl.u32 %v1100_v39, %v567_v46 }
  0x82   :  { %v430_v31 = vxor.u32 2147483648, %v429_v20  ;;  %v578_v7 = vshll.u32 %v1100_v39, %v566_v54  ;;  %v579_v27 = vshrl.u32 %v1101_v41, %v567_v46  ;;  %v655_v8 = vand.u32 2147483647, %v1373_v50 }
  0x83   :  { %v1503_v25 = vsub.s32 %v509_v51, %v512_v6  ;;  %v658_v45 = vand.u32 2139095040, %v1373_v50  ;;  %v568_v11 = vshrl.u32 %v1097_v33, %v567_v46  ;;  %v571_v38 = vor.u32 %v570_v14, %v569_v12 }
  0x84   :  { %v431_v15 = vsel %vm348_vm11, %v430_v31, %v429_v20  ;;  %v1511_v34 = vshll.u32 %v560_v29, 8  ;;  %vm234_vm1 = vcmp.lt.s32.totalorder %v1389_v61, 2  ;;  %v574_v18 = vor.u32 %v573_v26, %v572_v19 }
  0x85   :  { %v434_v28 = vsel %vm1447_vm13, %v1207_v0, %v431_v15  ;;  %v515_v42 = vsub.s32 0, %v1503_v25  ;;  %v580_v44 = vor.u32 %v579_v27, %v578_v7  ;;  %v577_v63 = vor.u32 %v576_v9, %v575_v24 }
  0x86   :  { %v581_v36 = vshll.u32 %v1101_v41, %v566_v54  ;;  %v582_v16 = vshrl.u32 %v1102_v49, %v567_v46  ;;  %vm584_vm2 = vcmp.lt.s32.totalorder %v565_v55, 1  ;;  %vm585_vm3 = vcmp.lt.s32.totalorder %v565_v55, 2 }
  0x87   :  { %v949_v22 = vmin.u32 %v515_v42, %v1503_v25  ;;  %vm586_vm4 = vcmp.lt.s32.totalorder %v565_v55, 3  ;;  %v659_v51 = vshrl.u32 %v658_v45, 23  ;;  %1025 = vcosq.f32 %v434_v28 }
  0x88   :  { %v583_v47 = vor.u32 %v582_v16, %v581_v36  ;;  %vm587_vm5 = vcmp.lt.s32.totalorder %v565_v55, 4  ;;  %v588_v23 = vsel %vm584_vm2, %v568_v11, %v571_v38  ;;  %vm232_vm6 = vweird.f32 %v1120_v4 }
  0x89   :  { %vm451_vm7 = vcmp.lt.s32.totalorder %v1265_v52, 0  ;;  %v517_v43 = vclz %v949_v22  ;;  %v589_v57 = vsel %vm587_vm5, %v577_v63, 2102212464  ;;  %v592_v62 = vsel %vm584_vm2, %v571_v38, %v574_v18 }
  0x8a   :  { %v593_v54 = vsel %vm587_vm5, %v580_v44, 920167782  ;;  %vm341_vm8 = vcmp.eq.s32.totalorder %v1482_v59, 2  ;;  %v590_v17 = vsel %vm586_vm4, %v574_v18, %v589_v57  ;;  %v596_v20 = vsel %vm584_vm2, %v574_v18, %v577_v63 }
  0x8b   :  { %v594_v46 = vsel %vm586_vm4, %v577_v63, %v593_v54  ;;  %v597_v29 = vsel %vm587_vm5, %v583_v47, 1326507024  ;;  %v1022_v12 = vpop.eup %1021  ;;  %vm338_vm9 = vcmp.eq.s32.totalorder %v1482_v59, 0  ;;  %v950_v6 = vadd.s32 4294967294, %v517_v43 }
  0x8c   :  { %v591_v14 = vsel %vm585_vm3, %v588_v23, %v590_v17  ;;  %v595_v19 = vsel %vm585_vm3, %v592_v62, %v594_v46  ;;  %v598_v24 = vsel %vm586_vm4, %v580_v44, %v597_v29  ;;  %v1024_v31 = vpop.eup %1023  ;;  %v505_v26 = vadd.s32 %v1435_v13, %v1443_v32 }
  0x8d   :  { %v599_v9 = vsel %vm585_vm3, %v596_v20, %v598_v24  ;;  %v1537_v7 = vmul.u32.u64.low %v1511_v34, %v595_v19  ;;  %v1538_v27 = vmul.u32.u64.high %v1511_v34, %v595_v19, %v1537_v7  ;;  %vm1542_vm10 = vcmp.le.f32.partialorder %v449_v40, 0.7853982 }
  0x8e   :  { %vm951_vm11 = vcmp.lt.s32.totalorder %v950_v6, 0  ;;  %v1547_v15 = vmul.u32.u64.low %v1511_v34, %v599_v9  ;;  %v1548_v11 = vmul.u32.u64.high %v1511_v34, %v599_v9, %v1547_v15  ;;  %v956_v38 = vadd.s32 4294967169, %v659_v51 }
  0x8f   :  { %1027 = vsinq.f32 %v434_v28  ;;  %v520_v13 = vsel %vm951_vm11, 0, %v950_v6  ;;  %v535_v32 = vsub.s32 4, %v1493_v2  ;;  %v607_v55 = vmul.u32 %v1511_v34, %v591_v14 }
  0x90   :  { %v521_v42 = vsub.s32 32, %v520_v13  ;;  %v522_v18 = vshll.u32 %v1503_v25, %v520_v13  ;;  %v525_v44 = vsub.s32 4294967266, %v520_v13  ;;  %v665_v40 = vadd.s32 1, %v956_v38 }
  0x91   :  { %v241_v63 = vsel %vm234_vm1, %v1486_v1, %v1488_v21  ;;  %v1561_v28 = vand.u32 3, %v435_v3  ;;  %v610_v36 = vadd.s32 1, %v1538_v27  ;;  %v662_v34 = vand.u32 8388607, %v655_v8 }
  0x92   :  { %v342_v16 = vxor.u32 2147483648, %v1022_v12  ;;  %v523_v25 = vshrl.u32 %v505_v26, %v521_v42  ;;  %v526_v22 = vadd.s32 127, %v525_v44  ;;  %vm609_vm12 = vc.u32 %v1548_v11, %v1537_v7 }
  0x93   :  { %v339_v51 = vxor.u32 2147483648, %v1024_v31  ;;  %v1570_v61 = vsel %vm451_vm7, %v535_v32, %v1493_v2  ;;  %v611_v60 = vsel %vm609_vm12, %v610_v36, %v1538_v27  ;;  %vm666_vm13 = vcmp.gt.s32.totalorder %v665_v40, 0 }
  0x94   :  { %v524_v53 = vor.u32 %v523_v25, %v522_v18  ;;  %v527_v1 = vshll.u32 %v526_v22, 23  ;;  %v612_v21 = vadd.s32 %v611_v60, %v607_v55  ;;  %v667_v3 = vsel %vm666_vm13, %v665_v40, 0  ;;  %v1578_v57 = vpop.eup %1025 }
  0x95   :  { %v1575_v47 = vsel %vm232_vm6, nan, %v241_v63  ;;  %vm444_vm15 = vcmp.eq.s32.totalorder %v1561_v28, 2  ;;  %v663_v23 = vor.u32 8388608, %v662_v34  ;;  %v669_v43 = vand.u32 31, %v667_v3 }
  0x96   :  { %v1582_v2 = vsel %vm341_vm8, %v342_v16, %v1024_v31  ;;  %v528_v62 = vor.u32 4788187, %v527_v1  ;;  %v531_v54 = vcvt.s32.f32 %v524_v53  ;;  %v613_v17 = vadd.s32 536870912, %v612_v21 }
  0x97   :  { %v1586_v46 = vsel %vm338_vm9, %v1022_v12, %v339_v51  ;;  %v538_v4 = vsel %vm1542_vm10, 0, %v1570_v61  ;;  %v670_v20 = vsub.s32 32, %v669_v43  ;;  %v758_v29 = vand.u32 2147483647, %v1378_v56 }
  0x98   :  { %v529_v6 = vand.u32 2147483647, %v528_v62  ;;  %v1593_v14 = vadd.s32 %v1537_v7, %v1548_v11  ;;  %v1595_v19 = vshrl.u32 %v613_v17, 30  ;;  %v761_v24 = vand.u32 2139095040, %v1378_v56 }
  0x99   :  { %v672_v31 = vshll.u32 %v1097_v33, %v669_v43  ;;  %v673_v12 = vshrl.u32 %v1098_v35, %v670_v20  ;;  %v675_v26 = vshll.u32 %v1098_v35, %v669_v43  ;;  %v1601_v9 = vshll.u32 %v663_v23, 8 }
  0x9a   :  { %vm441_vm14 = vcmp.eq.s32.totalorder %v1561_v28, 0  ;;  %v532_v27 = vmul.f32 %v531_v54, %v529_v6  ;;  %v615_v15 = vshll.u32 %v1595_v19, 30  ;;  %v676_v7 = vshrl.u32 %v1099_v37, %v670_v20 }
  0x9b   :  { %v678_v11 = vshll.u32 %v1099_v37, %v669_v43  ;;  %v445_v38 = vxor.u32 2147483648, %v1578_v57  ;;  %v668_v13 = vshrl.u32 %v667_v3, 5  ;;  %v679_v32 = vshrl.u32 %v1100_v39, %v670_v20 }
  0x9c   :  { %v681_v55 = vshll.u32 %v1100_v39, %v669_v43  ;;  %v1028_v42 = vpop.eup %1027  ;;  %v533_v18 = vxor.u32 2147483648, %v532_v27  ;;  %v1610_v44 = vsub.s32 %v612_v21, %v615_v15  ;;  %v682_v40 = vshrl.u32 %v1101_v41, %v670_v20 }
  0x9d   :  { %v762_v63 = vshrl.u32 %v761_v24, 23  ;;  %v671_v36 = vshrl.u32 %v1097_v33, %v670_v20  ;;  %v674_v34 = vor.u32 %v673_v12, %v672_v31  ;;  %v684_v16 = vshll.u32 %v1101_v41, %v669_v43 }
  0x9e   :  { %v685_v25 = vshrl.u32 %v1102_v49, %v670_v20  ;;  %vm337_vm0 = vcmp.lt.s32.totalorder %v1482_v59, 2  ;;  %vm440_vm1 = vcmp.lt.s32.totalorder %v1561_v28, 2  ;;  %v534_v22 = vsel %vm451_vm7, %v533_v18, %v532_v27 }
  0x9f   :  { %v618_v51 = vsub.s32 0, %v1610_v44  ;;  %v677_v60 = vor.u32 %v676_v7, %v675_v26  ;;  %v680_v53 = vor.u32 %v679_v32, %v678_v11  ;;  %v537_v1 = vsel %vm1542_vm10, %v1265_v52, %v534_v22 }
  0xa0   :  { %vm554_vm2 = vcmp.lt.s32.totalorder %v1371_v48, 0  ;;  %v683_v21 = vor.u32 %v682_v40, %v681_v55  ;;  %v686_v3 = vor.u32 %v685_v25, %v684_v16  ;;  %vm687_vm3 = vcmp.lt.s32.totalorder %v668_v13, 1 }
  0xa1   :  { %v442_v23 = vxor.u32 2147483648, %v1028_v42  ;;  %v446_v43 = vsel %vm444_vm15, %v445_v38, %v1028_v42  ;;  %1029 = vcosq.f32 %v537_v1  ;;  %v953_v62 = vmin.u32 %v618_v51, %v1610_v44 }
  0xa2   :  { %vm335_vm4 = vweird.f32 %v1122_v5  ;;  %1031 = vsinq.f32 %v537_v1  ;;  %vm688_vm5 = vcmp.lt.s32.totalorder %v668_v13, 2  ;;  %vm689_vm6 = vcmp.lt.s32.totalorder %v668_v13, 3 }
  0xa3   :  { %vm690_vm7 = vcmp.lt.s32.totalorder %v668_v13, 4  ;;  %vm438_vm8 = vweird.f32 %v1207_v0  ;;  %vm1632_vm9 = vcmp.le.f32.partialorder %v552_v10, 0.7853982  ;;  %v620_v17 = vclz %v953_v62 }
  0xa4   :  { %v691_v20 = vsel %vm687_vm3, %v671_v36, %v674_v34  ;;  %v692_v6 = vsel %vm690_vm7, %v680_v53, 2102212464  ;;  %v695_v24 = vsel %vm687_vm3, %v674_v34, %v677_v60  ;;  %v696_v12 = vsel %vm690_vm7, %v683_v21, 920167782 }
  0xa5   :  { %v693_v31 = vsel %vm689_vm6, %v677_v60, %v692_v6  ;;  %v699_v26 = vsel %vm687_vm3, %v677_v60, %v680_v53  ;;  %v700_v27 = vsel %vm690_vm7, %v686_v3, 1326507024  ;;  %v954_v15 = vadd.s32 4294967294, %v620_v17 }
  0xa6   :  { %v638_v7 = vsub.s32 4, %v1595_v19  ;;  %v697_v11 = vsel %vm689_vm6, %v680_v53, %v696_v12  ;;  %v701_v38 = vsel %vm689_vm6, %v683_v21, %v700_v27  ;;  %v443_v10 = vsel %vm441_vm14, %v1578_v57, %v442_v23 }
  0xa7   :  { %v698_v32 = vsel %vm688_vm5, %v695_v24, %v697_v11  ;;  %v702_v55 = vsel %vm688_vm5, %v699_v26, %v701_v38  ;;  %v960_v42 = vadd.s32 4294967169, %v762_v63  ;;  %vm955_vm11 = vcmp.lt.s32.totalorder %v954_v15, 0 }
  0xa8   :  { %v694_v18 = vsel %vm688_vm5, %v691_v20, %v693_v31  ;;  %v1647_v40 = vmul.u32.u64.low %v1601_v9, %v702_v55  ;;  %v1648_v36 = vmul.u32.u64.high %v1601_v9, %v702_v55, %v1647_v40  ;;  %v623_v34 = vsel %vm955_vm11, 0, %v954_v15 }
  0xa9   :  { %v1651_v16 = vmul.u32.u64.low %v1601_v9, %v698_v32  ;;  %v1652_v25 = vmul.u32.u64.high %v1601_v9, %v698_v32, %v1651_v16  ;;  %v768_v22 = vadd.s32 1, %v960_v42  ;;  %v624_v57 = vsub.s32 32, %v623_v34 }
  0xaa   :  { %v625_v51 = vshll.u32 %v1610_v44, %v623_v34  ;;  %v628_v60 = vsub.s32 4294967266, %v623_v34  ;;  %v639_v13 = vsel %vm554_vm2, %v638_v7, %v1595_v19  ;;  %v344_v63 = vsel %vm337_vm0, %v1586_v46, %v1582_v2 }
  0xab   :  { %v447_v53 = vsel %vm440_vm1, %v443_v10, %v446_v43  ;;  %v1669_v1 = vand.u32 3, %v538_v4  ;;  %vm769_vm12 = vcmp.gt.s32.totalorder %v768_v22, 0  ;;  %v626_v44 = vshrl.u32 %v1593_v14, %v624_v57 }
  0xac   :  { %v629_v21 = vadd.s32 127, %v628_v60  ;;  %v710_v19 = vmul.u32 %v1601_v9, %v694_v18  ;;  %vm712_vm13 = vc.u32 %v1648_v36, %v1651_v16  ;;  %v641_v59 = vsel %vm1632_vm9, 0, %v639_v13 }
  0xad   :  { %v713_v28 = vadd.s32 1, %v1652_v25  ;;  %v765_v45 = vand.u32 8388607, %v758_v29  ;;  %v770_v61 = vsel %vm769_vm12, %v768_v22, 0  ;;  %v345_v2 = vsel %vm335_vm4, nan, %v344_v63 }
  0xae   :  { %v627_v46 = vor.u32 %v626_v44, %v625_v51  ;;  %v630_v4 = vshll.u32 %v629_v21, 23  ;;  %v772_v14 = vand.u32 31, %v770_v61  ;;  %v1030_v3 = vpop.eup %1029  ;;  %v448_v9 = vsel %vm438_vm8, nan, %v447_v53 }
  0xaf   :  { %vm544_vm10 = vcmp.eq.s32.totalorder %v1669_v1, 0  ;;  %vm547_vm15 = vcmp.eq.s32.totalorder %v1669_v1, 2  ;;  %v714_v23 = vsel %vm712_vm13, %v713_v28, %v1652_v25  ;;  %v1032_v43 = vpop.eup %1031  ;;  %vm543_vm14 = vcmp.lt.s32.totalorder %v1669_v1, 2 }
  0xb0   :  { %v631_v62 = vor.u32 4788187, %v630_v4  ;;  %v634_v17 = vcvt.s32.f32 %v627_v46  ;;  %v1688_v5 = vand.u32 3, %v641_v59  ;;  %v715_v20 = vadd.s32 %v714_v23, %v710_v19 }
  0xb1   :  { %v548_v6 = vxor.u32 2147483648, %v1030_v3  ;;  %v766_v24 = vor.u32 8388608, %v765_v45  ;;  %v773_v31 = vsub.s32 32, %v772_v14  ;;  %v1691_v0 = vadd.f32 1.0, %v1476_v58 }
  0xb2   :  { %v545_v12 = vxor.u32 2147483648, %v1032_v43  ;;  %v632_v26 = vand.u32 2147483647, %v631_v62  ;;  %v716_v27 = vadd.s32 536870912, %v715_v20  ;;  %v1694_v15 = vadd.f32 1.0, %v1575_v47 }
  0xb3   :  { %v775_v7 = vshll.u32 %v1097_v33, %v772_v14  ;;  %v776_v11 = vshrl.u32 %v1098_v35, %v773_v31  ;;  %v778_v38 = vshll.u32 %v1098_v35, %v772_v14  ;;  %v781_v10 = vshll.u32 %v1099_v37, %v772_v14 }
  0xb4   :  { %vm541_vm0 = vweird.f32 %v1265_v52  ;;  %v635_v32 = vmul.f32 %v634_v17, %v632_v26  ;;  %v1701_v55 = vshrl.u32 %v716_v27, 30  ;;  %v779_v58 = vshrl.u32 %v1099_v37, %v773_v31 }
  0xb5   :  { %v782_v42 = vshrl.u32 %v1100_v39, %v773_v31  ;;  %v549_v47 = vsel %vm547_vm15, %v548_v6, %v1032_v43  ;;  %v771_v18 = vshrl.u32 %v770_v61, 5  ;;  %v784_v40 = vshll.u32 %v1100_v39, %v772_v14 }
  0xb6   :  { %v1708_v34 = vshll.u32 %v766_v24, 8  ;;  %v546_v35 = vsel %vm544_vm10, %v1030_v3, %v545_v12  ;;  %v636_v25 = vxor.u32 2147483648, %v635_v32  ;;  %v718_v22 = vshll.u32 %v1701_v55, 30 }
  0xb7   :  { %v774_v57 = vshrl.u32 %v1097_v33, %v773_v31  ;;  %v777_v51 = vor.u32 %v776_v11, %v775_v7  ;;  %v785_v37 = vshrl.u32 %v1101_v41, %v773_v31  ;;  %v787_v60 = vshll.u32 %v1101_v41, %v772_v14 }
  0xb8   :  { %v788_v13 = vshrl.u32 %v1102_v49, %v773_v31  ;;  %v637_v39 = vsel %vm554_vm2, %v636_v25, %v635_v32  ;;  %v1719_v63 = vsub.s32 %v715_v20, %v718_v22  ;;  %v780_v53 = vor.u32 %v779_v58, %v778_v38  ;;  %v1049_v25 = vld [vmem:[#allocation2 + $0x20] sm:$0xff] }
  0xb9   :  { %v783_v44 = vor.u32 %v782_v42, %v781_v10  ;;  %v640_v21 = vsel %vm1632_vm9, %v1371_v48, %v637_v39  ;;  %v786_v19 = vor.u32 %v785_v37, %v784_v40  ;;  %vm790_vm1 = vcmp.lt.s32.totalorder %v771_v18, 1  ;;  %v1045_v42 = vld [vmem:[#allocation2] sm:$0xff]  ;;  %v1047_v40 = vld [vmem:[#allocation2 + $0x10] sm:$0xff] }
  0xba   :  { %v789_v33 = vor.u32 %v788_v13, %v787_v60  ;;  %1033 = vcosq.f32 %v640_v21  ;;  %v721_v59 = vsub.s32 0, %v1719_v63  ;;  %v863_v41 = vadd.f32 1.0, %v345_v2 }
  0xbb   :  { %v864_v28 = vadd.f32 1.0, %v448_v9  ;;  %v550_v49 = vsel %vm543_vm14, %v546_v35, %v549_v47  ;;  %1035 = vsinq.f32 %v640_v21  ;;  %vm792_vm2 = vcmp.lt.s32.totalorder %v771_v18, 3 }
  0xbc   :  { %vm793_vm3 = vcmp.lt.s32.totalorder %v771_v18, 4  ;;  %v957_v45 = vmin.u32 %v721_v59, %v1719_v63  ;;  %vm791_vm4 = vcmp.lt.s32.totalorder %v771_v18, 2  ;;  %v794_v61 = vsel %vm790_vm1, %v774_v57, %v777_v51  ;;  %v1046_v18 = vld [vmem:[#allocation2 + $0x8] sm:$0xff] }
  0xbd   :  { %v798_v54 = vsel %vm790_vm1, %v777_v51, %v780_v53  ;;  %v795_v46 = vsel %vm793_vm3, %v783_v44, 2102212464  ;;  %v799_v4 = vsel %vm793_vm3, %v786_v19, 920167782  ;;  %v802_v14 = vsel %vm790_vm1, %v780_v53, %v783_v44 }
  0xbe   :  { %v803_v3 = vsel %vm793_vm3, %v789_v33, 1326507024  ;;  %v723_v23 = vclz %v957_v45  ;;  %v796_v43 = vsel %vm792_vm2, %v780_v53, %v795_v46  ;;  %v800_v62 = vsel %vm792_vm2, %v783_v44, %v799_v4 }
  0xbf   :  { %v804_v2 = vsel %vm792_vm2, %v786_v19, %v803_v3  ;;  %v551_v1 = vsel %vm541_vm0, nan, %v550_v49  ;;  %v797_v9 = vsel %vm791_vm4, %v794_v61, %v796_v43  ;;  %v801_v17 = vsel %vm791_vm4, %v798_v54, %v800_v62 }
  0xc0   :  { %v805_v20 = vsel %vm791_vm4, %v802_v14, %v804_v2  ;;  %vm647_vm5 = vcmp.eq.s32.totalorder %v1688_v5, 0  ;;  %vm650_vm6 = vcmp.eq.s32.totalorder %v1688_v5, 2  ;;  %v958_v6 = vadd.s32 4294967294, %v723_v23 }
  0xc1   :  { %v1733_v24 = vmul.u32.u64.low %v1708_v34, %v805_v20  ;;  %v1734_v31 = vmul.u32.u64.high %v1708_v34, %v805_v20, %v1733_v24  ;;  %vm646_vm7 = vcmp.lt.s32.totalorder %v1688_v5, 2  ;;  %v711_v12 = vadd.s32 %v1651_v16, %v1648_v36 }
  0xc2   :  { %v1740_v52 = vmul.u32.u64.low %v1708_v34, %v801_v17  ;;  %v1741_v26 = vmul.u32.u64.high %v1708_v34, %v801_v17, %v1740_v52  ;;  %v869_v27 = vmul.f32 0.5, %v1691_v0  ;;  %vm644_vm8 = vweird.f32 %v1371_v48 }
  0xc3   :  { %vm959_vm9 = vcmp.lt.s32.totalorder %v958_v6, 0  ;;  %v813_v7 = vmul.u32 %v1708_v34, %v797_v9  ;;  %v865_v11 = vadd.f32 1.0, %v551_v1  ;;  %v870_v38 = vmul.f32 0.5, %v1694_v15  ;;  %v1048_v34 = vld [vmem:[#allocation2 + $0x18] sm:$0xff] }
  0xc4   :  { %v726_v10 = vsel %vm959_vm9, 0, %v958_v6  ;;  %v871_v32 = vmul.f32 0.5, %v863_v41  ;;  %v872_v58 = vmul.f32 0.5, %v864_v28  ;;  %vm877_vm11 = vcmp.lt.f32.partialorder %v1045_v42, 5.0 }
  0xc5   :  { %v727_v36 = vsub.s32 32, %v726_v10  ;;  %v728_v16 = vshll.u32 %v1719_v63, %v726_v10  ;;  %v731_v47 = vsub.s32 4294967266, %v726_v10  ;;  %vm878_vm12 = vcmp.lt.f32.partialorder %v1046_v18, 5.0 }
  0xc6   :  { %vm815_vm13 = vc.u32 %v1734_v31, %v1740_v52  ;;  %v816_v0 = vadd.s32 1, %v1741_v26  ;;  %vm879_vm10 = vcmp.lt.f32.partialorder %v1047_v40, 5.0  ;;  %vm880_vm15 = vcmp.lt.f32.partialorder %v1048_v34, 5.0 }
  0xc7   :  { %v729_v15 = vshrl.u32 %v711_v12, %v727_v36  ;;  %v732_v35 = vadd.s32 127, %v731_v47  ;;  %vm881_vm14 = vcmp.lt.f32.partialorder %v1049_v25, 5.0  ;;  %v1034_v22 = vpop.eup %1033  ;;  %v873_v51 = vmul.f32 0.5, %v865_v11 }
  0xc8   :  { %v817_v57 = vsel %vm815_vm13, %v816_v0, %v1741_v26  ;;  %v1103_v37 = vmov 0.0   ;;  %v1036_v39 = vpop.eup %1035  ;;  %v651_v63 = vxor.u32 2147483648, %v1034_v22  ;;  %vm882_vm0 = vcmp.lt.f32.partialorder %v1353_v30, 5.0 }
  0xc9   :  { %v964_v60 = vsel %vm877_vm11, 1.0, %v1103_v37  ;;  %v965_v13 = vsel %vm878_vm12, 1.0, %v1103_v37  ;;  %v730_v53 = vor.u32 %v729_v15, %v728_v16  ;;  %v733_v44 = vshll.u32 %v732_v35, 23 }
  0xca   :  { %v818_v21 = vadd.s32 %v817_v57, %v813_v7  ;;  %v648_v19 = vxor.u32 2147483648, %v1036_v39  ;;  %v966_v33 = vsel %vm879_vm10, 1.0, %v1103_v37  ;;  %v967_v59 = vsel %vm880_vm15, 1.0, %v1103_v37 }
  0xcb   :  { %v968_v41 = vsel %vm881_vm14, 1.0, %v1103_v37  ;;  %v652_v28 = vsel %vm650_vm6, %v651_v63, %v1036_v39  ;;  %v734_v49 = vor.u32 4788187, %v733_v44  ;;  %v737_v45 = vcvt.s32.f32 %v730_v53  ;;  %v1050_v53 = vld [vmem:[#allocation2 + $0x30] sm:$0xff] }
  0xcc   :  { %v819_v61 = vadd.s32 536870912, %v818_v21  ;;  %v649_v54 = vsel %vm647_vm5, %v1034_v22, %v648_v19  ;;  %v901_v46 = vmul.f32 %v964_v60, %v869_v27  ;;  %v902_v23 = vmul.f32 %v965_v13, %v870_v38 }
  0xcd   :  { %v653_v4 = vsel %vm646_vm7, %v649_v54, %v652_v28  ;;  %v735_v14 = vand.u32 2147483647, %v734_v49  ;;  %v903_v62 = vmul.f32 %v966_v33, %v871_v32  ;;  %v904_v2 = vmul.f32 %v967_v59, %v872_v58 }
  0xce   :  { %v1769_v3 = vshrl.u32 %v819_v61, 30  ;;  %v654_v43 = vsel %vm644_vm8, nan, %v653_v4  ;;  %v905_v1 = vmul.f32 %v968_v41, %v873_v51  ;;  %909 = vst [vmem:[#allocation5] sm:$0xff] %v901_v46  ;;  %910 = vst [vmem:[#allocation5 + $0x8] sm:$0xff] %v902_v23  ;;  %vm657_vm1 = vcmp.lt.s32.totalorder %v1373_v50, 0 }
  0xcf   :  { %v738_v9 = vmul.f32 %v737_v45, %v735_v14  ;;  %v866_v20 = vadd.f32 1.0, %v654_v43  ;;  %v969_v5 = vsel %vm882_vm0, 1.0, %v1103_v37  ;;  %911 = vst [vmem:[#allocation5 + $0x10] sm:$0xff] %v903_v62  ;;  %912 = vst [vmem:[#allocation5 + $0x18] sm:$0xff] %v904_v2  ;;  %vm1780_vm2 = vcmp.le.f32.partialorder %v655_v8, 0.7853982 }
  0xd0   :  { %v821_v17 = vshll.u32 %v1769_v3, 30  ;;  %913 = vst [vmem:[#allocation5 + $0x20] sm:$0xff] %v905_v1  ;;  %v741_v30 = vsub.s32 4, %v1701_v55  ;;  %v814_v42 = vadd.s32 %v1740_v52, %v1734_v31  ;;  %vm747_vm7 = vweird.f32 %v1373_v50  ;;  %v1051_v2 = vld [vmem:[#allocation2 + $0x38] sm:$0xff] }
  0xd1   :  { %v739_v6 = vxor.u32 2147483648, %v738_v9  ;;  %v874_v12 = vmul.f32 0.5, %v866_v20  ;;  %vm883_vm8 = vcmp.lt.f32.partialorder %v1050_v53, 5.0  ;;  %vm760_vm9 = vcmp.lt.s32.totalorder %v1378_v56, 0 }
  0xd2   :  { %v822_v24 = vsub.s32 %v818_v21, %v821_v17  ;;  %v742_v10 = vsel %vm657_vm1, %v741_v30, %v1701_v55  ;;  %vm759_vm11 = vcmp.le.f32.partialorder %v758_v29, 0.7853982  ;;  %v970_v33 = vsel %vm883_vm8, 1.0, %v1103_v37 }
  0xd3   :  { %v740_v26 = vsel %vm657_vm1, %v739_v6, %v738_v9  ;;  %v906_v7 = vmul.f32 %v969_v5, %v874_v12  ;;  %v744_v58 = vsel %vm1780_vm2, 0, %v742_v10  ;;  %vm850_vm15 = vweird.f32 %v1378_v56 }
  0xd4   :  { %v824_v27 = vsub.s32 0, %v822_v24  ;;  %v743_v11 = vsel %vm1780_vm2, %v1373_v50, %v740_v26  ;;  %v748_v0 = vand.u32 3, %v744_v58  ;;  %v844_v50 = vsub.s32 4, %v1769_v3 }
  0xd5   :  { %1037 = vcosq.f32 %v743_v11  ;;  %914 = vst [vmem:[#allocation5 + $0x28] sm:$0xff] %v906_v7  ;;  %vm884_vm14 = vcmp.lt.f32.partialorder %v1051_v2, 5.0 }
  0xd6   :  { %v961_v38 = vmin.u32 %v824_v27, %v822_v24  ;;  %1039 = vsinq.f32 %v743_v11  ;;  %vm753_vm4 = vcmp.eq.s32.totalorder %v748_v0, 2  ;;  %vm750_vm5 = vcmp.eq.s32.totalorder %v748_v0, 0 }
  0xd7   :  { %vm749_vm6 = vcmp.lt.s32.totalorder %v748_v0, 2  ;;  %v845_v45 = vsel %vm760_vm9, %v844_v50, %v1769_v3  ;;  %v971_v3 = vsel %vm884_vm14, 1.0, %v1103_v37 }
  0xd8   :  { %v826_v8 = vclz %v961_v38  ;;  %v847_v61 = vsel %vm759_vm11, 0, %v845_v45 }
  0xd9   :  { %v851_v54 = vand.u32 3, %v847_v61 }
  0xda   :  { %v962_v32 = vadd.s32 4294967294, %v826_v8 }
  0xdb   :  { %vm856_vm12 = vcmp.eq.s32.totalorder %v851_v54, 2  ;;  %vm853_vm13 = vcmp.eq.s32.totalorder %v851_v54, 0  ;;  %vm852_vm10 = vcmp.lt.s32.totalorder %v851_v54, 2 }
  0xdc   :  { %vm963_vm3 = vcmp.lt.s32.totalorder %v962_v32, 0 }
  0xdd   :  { %v829_v36 = vsel %vm963_vm3, 0, %v962_v32 }
  0xde   :  { %v830_v16 = vsub.s32 32, %v829_v36  ;;  %v831_v47 = vshll.u32 %v822_v24, %v829_v36  ;;  %v834_v18 = vsub.s32 4294967266, %v829_v36 }
  0xe0   :  { %v832_v40 = vshrl.u32 %v814_v42, %v830_v16  ;;  %v835_v34 = vadd.s32 127, %v834_v18 }
  0xe2   :  { %v833_v15 = vor.u32 %v832_v40, %v831_v47  ;;  %v836_v35 = vshll.u32 %v835_v34, 23  ;;  %v1038_v25 = vpop.eup %1037 }
  0xe3   :  { %v1040_v55 = vpop.eup %1039  ;;  %v754_v22 = vxor.u32 2147483648, %v1038_v25 }
  0xe4   :  { %v837_v57 = vor.u32 4788187, %v836_v35  ;;  %v840_v51 = vcvt.s32.f32 %v833_v15  ;;  %v751_v60 = vxor.u32 2147483648, %v1040_v55 }
  0xe5   :  { %v755_v31 = vsel %vm753_vm4, %v754_v22, %v1040_v55 }
  0xe6   :  { %v838_v52 = vand.u32 2147483647, %v837_v57  ;;  %v752_v13 = vsel %vm750_vm5, %v1038_v25, %v751_v60 }
  0xe7   :  { %v756_v39 = vsel %vm749_vm6, %v752_v13, %v755_v31 }
  0xe8   :  { %v841_v63 = vmul.f32 %v840_v51, %v838_v52  ;;  %v757_v44 = vsel %vm747_vm7, nan, %v756_v39 }
  0xe9   :  { %v867_v19 = vadd.f32 1.0, %v757_v44 }
  0xea   :  { %v842_v21 = vxor.u32 2147483648, %v841_v63 }
  0xeb   :  { %v875_v41 = vmul.f32 0.5, %v867_v19 }
  0xec   :  { %v843_v59 = vsel %vm760_vm9, %v842_v21, %v841_v63 }
  0xed   :  { %v846_v28 = vsel %vm759_vm11, %v1378_v56, %v843_v59  ;;  %v907_v49 = vmul.f32 %v970_v33, %v875_v41 }
  0xee   :  { %1041 = vcosq.f32 %v846_v28 }
  0xef   :  { %1043 = vsinq.f32 %v846_v28  ;;  %915 = vst [vmem:[#allocation5 + $0x30] sm:$0xff] %v907_v49 }
  0xfb   :  { %v1042_v46 = vpop.eup %1041 }
  0xfc   :  { %v1044_v29 = vpop.eup %1043  ;;  %v857_v4 = vxor.u32 2147483648, %v1042_v46 }
  0xfd   :  { %v854_v14 = vxor.u32 2147483648, %v1044_v29 }
  0xfe   :  { %v858_v23 = vsel %vm856_vm12, %v857_v4, %v1044_v29 }
  0xff   :  { %v855_v43 = vsel %vm853_vm13, %v1042_v46, %v854_v14 }
 0x100   :  { %v859_v62 = vsel %vm852_vm10, %v855_v43, %v858_v23 }
 0x101   :  { %v860_v1 = vsel %vm850_vm15, nan, %v859_v62 }
 0x102   :  { %v868_v9 = vadd.f32 1.0, %v860_v1 }
 0x104   :  { %v876_v17 = vmul.f32 0.5, %v868_v9 }
 0x106   :  { %v908_v20 = vmul.f32 %v971_v3, %v876_v17 }
 0x108   :  { %916 = vst [vmem:[#allocation5 + $0x38] sm:$0xff] %v908_v20 }
 0x109   :  { %1083 = shalt.err (!%p1080_p9)
}
 0x10a   :  { %926 = dma.vmem_to_hbm [thread:$0]  %s924_s11, 1024, %s1811_s1, [#allocation4]  }
 0x10b   :  { %1094 = dma.done.wait [#allocation4], 1024  }
 0x10c   :  { %1095 = vsyncadd [#allocation4], 4294966272 }
 0x10d   :  { %930 = vsyncpa [#allocation3], 1 }
 0x10e   :  { %931 = vsyncpa [#allocation4], 1 }

</bundles_post_ra>
